<compile_context>
chip_gen: v7x
topology: tpu7x:2x2x1
jax: 0.10.0
libtpu: 0.0.40
codegen_flags: <defaults>
</compile_context>

<pallas_src>
import functools

import jax
import jax.numpy as jnp
from jax.experimental import pallas as pl
from jax.experimental.pallas import tpu as pltpu


def _round_up(x, m):
    return ((x + m - 1) // m) * m


def policy_kernel(x_ref, w1_ref, b1_ref, w2_ref, b2_ref, o_ref):
    x = x_ref[...]            # [TB, S] f32
    w1 = w1_ref[...]          # [S, F] f32
    tb = x.shape[0]
    s = x.shape[1]
    f = w1.shape[1]

    # ---- fc1: x @ W1 + b1, ReLU ------------------------------------------
    if s <= 8:
        # Tiny K: VPU broadcast-MACs beat the MXU push/pop round-trip.
        h = jnp.broadcast_to(b1_ref[...], (tb, f))
        for k in range(s):                      # static unroll (S known at trace)
            h = h + x[:, k:k + 1] * w1[k:k + 1, :]
    else:
        h = jnp.dot(x, w1, preferred_element_type=jnp.float32) + b1_ref[...]
    h = jnp.maximum(h, 0.0)

    # ---- fc2 on the MXU in bf16, f32 accumulate + f32 bias -----------------
    # W2/bias are padded to A_pad lanes; pad-lane bias is -1e30 so exp() of
    # the pad logits contributes ~0 to the softmax denominator.
    logits = (
        jnp.dot(h.astype(jnp.bfloat16), w2_ref[...],
                preferred_element_type=jnp.float32)
        + b2_ref[...]
    )

    # ---- softmax over the (narrow, padded) lane axis -----------------------
    m = jnp.max(logits, axis=-1, keepdims=True)
    e = jnp.exp(logits - m)
    denom = jnp.sum(e, axis=-1, keepdims=True)
    o_ref[...] = (e / denom).astype(o_ref.dtype)   # exact divide (cheap on VALU)


def prepare_params(w1, b1, w2, b2):
    """One-time padding / casting of the parameters (hoisted out of the
    per-call path).

    w1: [S, F], b1: [*, F], w2: [F, A], b2: [*, A]
    Returns (w1_f32 [S,F], b1_f32 [1,F], w2p_bf16 [F,A_pad], b2p_f32 [1,A_pad]).
    """
    F, A = w2.shape
    A_pad = max(8, _round_up(A, 8))
    w2p = (
        jnp.zeros((F, A_pad), jnp.bfloat16)
        .at[:, :A]
        .set(w2.astype(jnp.bfloat16))
    )
    b2p = (
        jnp.full((1, A_pad), -1e30, jnp.float32)
        .at[:, :A]
        .set(b2.astype(jnp.float32).reshape(1, A))
    )
    return (
        w1.astype(jnp.float32),
        b1.astype(jnp.float32).reshape(1, F),
        w2p,
        b2p,
    )


@functools.partial(jax.jit, static_argnames=("action_size",))
def policy_forward(x, w1, b1, w2p, b2p, *, action_size):
    """x: [B, state_size]; params from prepare_params(); -> [B, action_size]."""
    B, S = x.shape
    F = w1.shape[1]
    A_pad = w2p.shape[1]

    # ---- batch tiling -------------------------------------------------------
    # Round batch to the 8-row sublane granularity (not power-of-2), cap the
    # tile generously (VMEM footprint is tiny even at TB=2048), and use >=2
    # grid steps for B > 16 so v7x's two TensorCores both get work.
    TB_CAP = 2048
    B8 = _round_up(B, 8)
    n_tiles = 1 if B8 <= 16 else max(2, pl.cdiv(B8, TB_CAP))
    TB = _round_up(pl.cdiv(B8, n_tiles), 8)
    B_pad = pl.cdiv(B8, TB) * TB

    xp = x.astype(jnp.float32)
    if B_pad != B:
        xp = jnp.pad(xp, ((0, B_pad - B), (0, 0)))

    grid = (B_pad // TB,)
    out = pl.pallas_call(
        policy_kernel,
        out_shape=jax.ShapeDtypeStruct((B_pad, A_pad), jnp.float32),
        grid=grid,
        in_specs=[
            pl.BlockSpec((TB, S), lambda i: (i, 0)),
            pl.BlockSpec((S, F), lambda i: (0, 0)),
            pl.BlockSpec((1, F), lambda i: (0, 0)),
            pl.BlockSpec((F, A_pad), lambda i: (0, 0)),
            pl.BlockSpec((1, A_pad), lambda i: (0, 0)),
        ],
        out_specs=pl.BlockSpec((TB, A_pad), lambda i: (i, 0)),
        compiler_params=pltpu.CompilerParams(
            dimension_semantics=("parallel",),
        ),
        cost_estimate=pl.CostEstimate(
            flops=2 * B_pad * (S * F + F * A_pad),
            transcendentals=B_pad * A_pad,
            bytes_accessed=(
                4 * (B_pad * S + S * F + F + A_pad + B_pad * A_pad)
                + 2 * F * A_pad
            ),
        ),
    )(xp, w1, b1, w2p, b2p)

    # Narrow (A_pad = 8-lane) output keeps this slice tiny; a fully fused
    # pipeline would return `out` and index in the consumer instead.
    return out[:B, :action_size]


def init_params(key, state_size, action_size, fc1_units=128):
    """Deterministic init mimicking nn.Linear default (uniform +/- 1/sqrt(fan_in))."""
    k1, k2, k3, k4 = jax.random.split(key, 4)
    lim1 = 1.0 / jnp.sqrt(jnp.float32(state_size))
    lim2 = 1.0 / jnp.sqrt(jnp.float32(fc1_units))
    w1 = jax.random.uniform(k1, (state_size, fc1_units), jnp.float32, -lim1, lim1)
    b1 = jax.random.uniform(k2, (1, fc1_units), jnp.float32, -lim1, lim1)
    w2 = jax.random.uniform(k3, (fc1_units, action_size), jnp.float32, -lim2, lim2)
    b2 = jax.random.uniform(k4, (1, action_size), jnp.float32, -lim2, lim2)
    return w1, b1, w2, b2


if __name__ == "__main__":
    # CartPole-like sizes: state_size=4, action_size=2, fc1_units=128
    state_size, action_size, fc1_units = 4, 2, 128
    batch = 8

    key = jax.random.PRNGKey(0)
    kx, kp = jax.random.split(key)
    x = jax.random.normal(kx, (batch, state_size), jnp.float32)
    w1, b1, w2, b2 = init_params(kp, state_size, action_size, fc1_units)

    # Pad / cast the second-layer weights ONCE (not per forward call).
    w1p, b1p, w2p, b2p = prepare_params(w1, b1, w2, b2)

    out = policy_forward(x, w1p, b1p, w2p, b2p, action_size=action_size)
    out = jax.block_until_ready(out)

    # Reference in plain JAX (f32). fc2 runs in bf16 on the MXU inside the
    # kernel, so tolerance covers bf16 rounding of the 128-term dot.
    h_ref = jnp.maximum(x @ w1 + b1, 0.0)
    ref = jax.nn.softmax(h_ref @ w2 + b2, axis=-1)
    assert out.shape == (batch, action_size)
    assert jnp.allclose(out, ref, atol=1e-2, rtol=1e-2)
    assert jnp.allclose(jnp.sum(out, axis=-1), 1.0, atol=1e-5)

    # Also exercise the padded, multi-tile (grid >= 2) path.
    x2 = jax.random.normal(jax.random.PRNGKey(1), (20, state_size), jnp.float32)
    out2 = jax.block_until_ready(
        policy_forward(x2, w1p, b1p, w2p, b2p, action_size=action_size)
    )
    ref2 = jax.nn.softmax(jnp.maximum(x2 @ w1 + b1, 0.0) @ w2 + b2, axis=-1)
    assert out2.shape == (20, action_size)
    assert jnp.allclose(out2, ref2, atol=1e-2, rtol=1e-2)

    print("KERNEL_OK")
</pallas_src>

<mosaic_0001>
module attributes {stable_mosaic.version = 11 : i64} {
  func.func @policy_kernel(%arg0: i32, %arg1: memref<8x4xf32, #tpu.memory_space<vmem>>, %arg2: memref<4x128xf32, #tpu.memory_space<vmem>>, %arg3: memref<1x128xf32, #tpu.memory_space<vmem>>, %arg4: memref<128x8xbf16, #tpu.memory_space<vmem>>, %arg5: memref<1x8xf32, #tpu.memory_space<vmem>>, %arg6: memref<8x8xf32, #tpu.memory_space<vmem>>) attributes {dimension_semantics = [#tpu.dimension_semantics<parallel>], iteration_bounds = array<i64: 1>, scalar_prefetch = 0 : i64, scratch_operands = 0 : i64, tpu.core_type = #tpu.core_type<tc>, window_params = [{transform_indices = @transform_0, window_bounds = array<i64: 8, 4>}, {pipeline_mode = #tpu.pipeline_mode<synchronous>, transform_indices = @transform_1, window_bounds = array<i64: 4, 128>}, {pipeline_mode = #tpu.pipeline_mode<synchronous>, transform_indices = @transform_2, window_bounds = array<i64: 1, 128>}, {pipeline_mode = #tpu.pipeline_mode<synchronous>, transform_indices = @transform_3, window_bounds = array<i64: 128, 8>}, {pipeline_mode = #tpu.pipeline_mode<synchronous>, transform_indices = @transform_4, window_bounds = array<i64: 1, 8>}, {transform_indices = @transform_5, window_bounds = array<i64: 8, 8>}]} {
    %c0 = arith.constant 0 : index
    %c0_0 = arith.constant 0 : index
    %0 = vector.load %arg1[%c0, %c0_0] : memref<8x4xf32, #tpu.memory_space<vmem>>, vector<8x4xf32>
    %c0_1 = arith.constant 0 : index
    %c0_2 = arith.constant 0 : index
    %1 = vector.load %arg2[%c0_1, %c0_2] : memref<4x128xf32, #tpu.memory_space<vmem>>, vector<4x128xf32>
    %c0_3 = arith.constant 0 : index
    %c0_4 = arith.constant 0 : index
    %2 = vector.load %arg3[%c0_3, %c0_4] : memref<1x128xf32, #tpu.memory_space<vmem>>, vector<1x128xf32>
    %3 = vector.shape_cast %2 : vector<1x128xf32> to vector<1x128xf32>
    %4 = vector.broadcast %3 : vector<1x128xf32> to vector<8x128xf32>
    %5 = vector.extract_strided_slice %0 {offsets = [0, 0], sizes = [8, 1], strides = [1, 1]} : vector<8x4xf32> to vector<8x1xf32>
    %6 = vector.extract_strided_slice %1 {offsets = [0, 0], sizes = [1, 128], strides = [1, 1]} : vector<4x128xf32> to vector<1x128xf32>
    %7 = vector.broadcast %5 : vector<8x1xf32> to vector<8x128xf32>
    %8 = vector.broadcast %6 : vector<1x128xf32> to vector<8x128xf32>
    %9 = arith.mulf %7, %8 : vector<8x128xf32>
    %10 = arith.addf %4, %9 : vector<8x128xf32>
    %11 = vector.extract_strided_slice %0 {offsets = [0, 1], sizes = [8, 1], strides = [1, 1]} : vector<8x4xf32> to vector<8x1xf32>
    %12 = vector.extract_strided_slice %1 {offsets = [1, 0], sizes = [1, 128], strides = [1, 1]} : vector<4x128xf32> to vector<1x128xf32>
    %13 = vector.broadcast %11 : vector<8x1xf32> to vector<8x128xf32>
    %14 = vector.broadcast %12 : vector<1x128xf32> to vector<8x128xf32>
    %15 = arith.mulf %13, %14 : vector<8x128xf32>
    %16 = arith.addf %10, %15 : vector<8x128xf32>
    %17 = vector.extract_strided_slice %0 {offsets = [0, 2], sizes = [8, 1], strides = [1, 1]} : vector<8x4xf32> to vector<8x1xf32>
    %18 = vector.extract_strided_slice %1 {offsets = [2, 0], sizes = [1, 128], strides = [1, 1]} : vector<4x128xf32> to vector<1x128xf32>
    %19 = vector.broadcast %17 : vector<8x1xf32> to vector<8x128xf32>
    %20 = vector.broadcast %18 : vector<1x128xf32> to vector<8x128xf32>
    %21 = arith.mulf %19, %20 : vector<8x128xf32>
    %22 = arith.addf %16, %21 : vector<8x128xf32>
    %23 = vector.extract_strided_slice %0 {offsets = [0, 3], sizes = [8, 1], strides = [1, 1]} : vector<8x4xf32> to vector<8x1xf32>
    %24 = vector.extract_strided_slice %1 {offsets = [3, 0], sizes = [1, 128], strides = [1, 1]} : vector<4x128xf32> to vector<1x128xf32>
    %25 = vector.broadcast %23 : vector<8x1xf32> to vector<8x128xf32>
    %26 = vector.broadcast %24 : vector<1x128xf32> to vector<8x128xf32>
    %27 = arith.mulf %25, %26 : vector<8x128xf32>
    %28 = arith.addf %22, %27 : vector<8x128xf32>
    %cst = arith.constant 0.000000e+00 : f32
    %29 = vector.broadcast %cst : f32 to vector<8x128xf32>
    %30 = arith.maximumf %28, %29 : vector<8x128xf32>
    %31 = arith.truncf %30 : vector<8x128xf32> to vector<8x128xbf16>
    %c0_5 = arith.constant 0 : index
    %c0_6 = arith.constant 0 : index
    %32 = vector.load %arg4[%c0_5, %c0_6] : memref<128x8xbf16, #tpu.memory_space<vmem>>, vector<128x8xbf16>
    %cst_7 = arith.constant dense<0.000000e+00> : vector<8x8xf32>
    %33 = tpu.matmul %31, %32, %cst_7 {dimension_numbers = #tpu.dot_dimension_numbers<[1], [0], [0], [1], [0, 0, 1, 1], [], []>} : vector<8x128xbf16>, vector<128x8xbf16>, vector<8x8xf32> -> vector<8x8xf32>
    %c0_8 = arith.constant 0 : index
    %c0_9 = arith.constant 0 : index
    %34 = vector.load %arg5[%c0_8, %c0_9] : memref<1x8xf32, #tpu.memory_space<vmem>>, vector<1x8xf32>
    %35 = vector.broadcast %34 : vector<1x8xf32> to vector<8x8xf32>
    %36 = arith.addf %33, %35 : vector<8x8xf32>
    %cst_10 = arith.constant dense<0xFF800000> : vector<8xf32>
    %37 = vector.multi_reduction <maximumf>, %36, %cst_10 [1] : vector<8x8xf32> to vector<8xf32>
    %38 = vector.shape_cast %37 : vector<8xf32> to vector<8x1xf32>
    %39 = vector.broadcast %38 : vector<8x1xf32> to vector<8x8xf32>
    %40 = arith.subf %36, %39 : vector<8x8xf32>
    %41 = math.exp %40 : vector<8x8xf32>
    %cst_11 = arith.constant dense<0.000000e+00> : vector<8xf32>
    %42 = vector.multi_reduction <add>, %41, %cst_11 [1] : vector<8x8xf32> to vector<8xf32>
    %43 = vector.shape_cast %42 : vector<8xf32> to vector<8x1xf32>
    %44 = vector.broadcast %43 : vector<8x1xf32> to vector<8x8xf32>
    %45 = arith.divf %41, %44 : vector<8x8xf32>
    %c0_12 = arith.constant 0 : index
    %c0_13 = arith.constant 0 : index
    %46 = vector.load %arg6[%c0_12, %c0_13] : memref<8x8xf32, #tpu.memory_space<vmem>>, vector<8x8xf32>
    tpu.vector_store %arg6[%c0_12, %c0_13], %45 {strides = array<i32>} : memref<8x8xf32, #tpu.memory_space<vmem>>, vector<8x8xf32>,
    return
  }
  func.func @transform_0(%arg0: i32) -> (i32, i32) {
    %c0_i32 = arith.constant 0 : i32
    %c0_i32_0 = arith.constant 0 : i32
    return %arg0, %c0_i32 : i32, i32
  }
  func.func @transform_1(%arg0: i32) -> (i32, i32) {
    %c0_i32 = arith.constant 0 : i32
    %c0_i32_0 = arith.constant 0 : i32
    %c0_i32_1 = arith.constant 0 : i32
    return %c0_i32, %c0_i32_0 : i32, i32
  }
  func.func @transform_2(%arg0: i32) -> (i32, i32) {
    %c0_i32 = arith.constant 0 : i32
    %c0_i32_0 = arith.constant 0 : i32
    %c0_i32_1 = arith.constant 0 : i32
    return %c0_i32, %c0_i32_0 : i32, i32
  }
  func.func @transform_3(%arg0: i32) -> (i32, i32) {
    %c0_i32 = arith.constant 0 : i32
    %c0_i32_0 = arith.constant 0 : i32
    %c0_i32_1 = arith.constant 0 : i32
    return %c0_i32, %c0_i32_0 : i32, i32
  }
  func.func @transform_4(%arg0: i32) -> (i32, i32) {
    %c0_i32 = arith.constant 0 : i32
    %c0_i32_0 = arith.constant 0 : i32
    %c0_i32_1 = arith.constant 0 : i32
    return %c0_i32, %c0_i32_0 : i32, i32
  }
  func.func @transform_5(%arg0: i32) -> (i32, i32) {
    %c0_i32 = arith.constant 0 : i32
    %c0_i32_0 = arith.constant 0 : i32
    return %arg0, %c0_i32 : i32, i32
  }
}

</mosaic_0001>

<bundles_post_ra>
// kernel: policy_forward.1
= control target key start
LH: loop header
LB: loop body
LE: loop exit
PB: predicated region body
PF: predicated region fallthrough
CT: control target
= control target key end

     0   :  { %v263_v0 = vmov 0   ;;  %v264_v2 = vmov 2   ;;  %v265_v4 = vmov 0.0   ;;  %v266_v6 = vmov 1   ;;  %s341_s0 = inlined_call_operand.vmem [shape: f32[8,4], index: 0, kind: input, shape index: {}]   ;;  %s342_s3 = inlined_call_operand.vmem [shape: bf16[128,8], index: 3, kind: input, shape index: {}]   ;;  %s343_s1 = inlined_call_operand.vmem [shape: f32[4,128], index: 1, kind: input, shape index: {}]   ;;  %s344_s2 = inlined_call_operand.vmem [shape: f32[1,128], index: 2, kind: input, shape index: {}]   ;;  %s345_s4 = inlined_call_operand.vmem [shape: f32[1,8], index: 4, kind: input, shape index: {}]   ;;  %s346_s5 = inlined_call_operand.vmem [shape: f32[8,8], index: 5, kind: output, shape index: {}]  }
   0x1   :  { %246 = vset.pattern.permute.xlu0 %v263_v0  ;;  %v21_v1 = vld [vmem:[%s341_s0] sm:$0xff]  ;;  %248 = vset.pattern.permute.xlu1 %v264_v2  ;;  %v252_v5 = vld [vmem:[%s342_s3 + $0x8] sm:$0xff]   ;;  %v267_v7 = vmov 3   ;;  %v253_v8 = vld [vmem:[%s342_s3 + $0x10] sm:$0xff]   ;;  %vm268_vm0 = vmmov 0   ;;  %v35_v14 = vlaneseq  ;;  %vm184_vm1 = vcmask 64512  }
   0x2   :  { %32 = vperm.xlu0 %246, %v21_v1   ;;  %52 = vperm.xlu1 %248, %v21_v1   ;;  %v251_v3 = vld [vmem:[%s342_s3] sm:$0xff]   ;;  %v254_v9 = vld [vmem:[%s342_s3 + $0x18] sm:$0xff]   ;;  %v256_v11 = vld [vmem:[%s342_s3 + $0x28] sm:$0xff]  }
   0x3   :  { %220 = vmatprep.subr.bf16.mxu0 %v265_v4  ;;  %v255_v10 = vld [vmem:[%s342_s3 + $0x20] sm:$0xff]   ;;  %236 = vmatprep.mubr.msk.bf16.mxu0 %vm268_vm0, %v265_v4  ;;  %v257_v12 = vld [vmem:[%s342_s3 + $0x30] sm:$0xff]   ;;  %v258_v13 = vld [vmem:[%s342_s3 + $0x38] sm:$0xff]   ;;  %v36_v15 = vshrl.u32 %v35_v14, 7 }
   0x4   :  { %221 = vmatpush3.bf16.msra.mxu0 %v251_v3  ;;  %v22_v17 = vld [vmem:[%s343_s1] sm:$0xf] }
   0x5   :  { %222 = vmatprep.subr.bf16.mxu0 %v265_v4  ;;  %v37_v16 = vsub.s32 0, %v36_v15  ;;  %v47_v19 = vsub.s32 1, %v36_v15  ;;  %v57_v21 = vsub.s32 2, %v36_v15  ;;  %v67_v23 = vsub.s32 3, %v36_v15  ;;  %v201_v26 = vld [vmem:[%s344_s2] ss:$0 sm:$0xff] }
   0x6   :  { %247 = vset.pattern.permute.xlu0 %v266_v6  ;;  %249 = vset.pattern.permute.xlu1 %v267_v7  ;;  %v202_v40 = vld [vmem:[%s345_s4] ss:$0 sm:$0xff] }
   0x7   :  { %42 = vperm.xlu0 %247, %v21_v1   ;;  %62 = vperm.xlu1 %249, %v21_v1   ;;  %v38_v18 = vrot.slane %v22_v17, %v37_v16  ;;  %v48_v25 = vrot.slane %v22_v17, %v47_v19  ;;  %v58_v27 = vrot.slane %v22_v17, %v57_v21 }
   0x8   :  { %223 = vmatpush3.bf16.msra.mxu0 %v252_v5  ;;  %v68_v28 = vrot.slane %v22_v17, %v67_v23 }
   0x9   :  { %224 = vmatprep.subr.bf16.mxu0 %v265_v4 }
   0xb   :  { %250 = vset.pattern.permute.xlu0 %v267_v7 }
   0xc   :  { %225 = vmatpush3.bf16.msra.mxu0 %v253_v8 }
   0xd   :  { %226 = vmatprep.subr.bf16.mxu0 %v265_v4 }
  0x10   :  { %227 = vmatpush3.bf16.msra.mxu0 %v254_v9 }
  0x11   :  { %228 = vmatprep.subr.bf16.mxu0 %v265_v4 }
  0x14   :  { %229 = vmatpush3.bf16.msra.mxu0 %v255_v10 }
  0x15   :  { %230 = vmatprep.subr.bf16.mxu0 %v265_v4 }
  0x18   :  { %231 = vmatpush3.bf16.msra.mxu0 %v256_v11 }
  0x19   :  { %232 = vmatprep.subr.bf16.mxu0 %v265_v4 }
  0x1c   :  { %233 = vmatpush3.bf16.msra.mxu0 %v257_v12 }
  0x1d   :  { %234 = vmatprep.subr.bf16.mxu0 %v265_v4 }
  0x20   :  { %235 = vmatpush3.bf16.msra.mxu0 %v258_v13 }
  0x81   :  { %v33_v20 = vpop.permute.xlu0 %32  ;;  %v53_v22 = vpop.permute.xlu1 %52 }
  0x82   :  { %v39_v24 = vmul.f32 %v38_v18, %v33_v20  ;;  %v59_v33 = vmul.f32 %v58_v27, %v53_v22 }
  0x84   :  { %v40_v31 = vadd.f32 %v201_v26, %v39_v24 }
  0x86   :  { %v43_v29 = vpop.permute.xlu0 %42  ;;  %v63_v30 = vpop.permute.xlu1 %62 }
  0x87   :  { %v49_v32 = vmul.f32 %v48_v25, %v43_v29  ;;  %v69_v35 = vmul.f32 %v68_v28, %v63_v30 }
  0x89   :  { %v50_v34 = vadd.f32 %v49_v32, %v40_v31 }
  0x8b   :  { %v60_v36 = vadd.f32 %v59_v33, %v50_v34 }
  0x8d   :  { %v70_v37 = vadd.f32 %v69_v35, %v60_v36 }
  0x8f   :  { %v71_v38 = vmax.f32 %v70_v37, 0.0 }
  0x91   :  { %v72_v39 = vpack.c.bf16 %v71_v38, %v71_v38 }
  0x93   :  { %237 = vmatmul.mubr.bf16.vlgmr.msra.gmra.mrb[0].mxu0 %v72_v39 }
 0x166   :  { %v178_v41 = vpop.f32.mrb[0].mxu0 }
 0x167   :  { %v179_v42 = vadd.f32 %v202_v40, %v178_v41  ;;  %v238_v43 = vpop.f32.mrb[1].mxu0 }
 0x168   :  { %v181_v44 = vpop.f32.mrb[2].mxu0 }
 0x169   :  { %v239_v45 = vpop.f32.mrb[3].mxu0  ;;  %v185_v46 = vsel %vm184_vm1, %v179_v42, -inf }
 0x16a   :  { %186 = vmax.xlane.f32.xlu1 %v185_v46 }
 0x1f7   :  { %v187_v47 = vpop.xlane.xlu1 %186 }
 0x1f8   :  { %v188_v48 = vsub.f32 %v179_v42, %v187_v47 }
 0x1fa   :  { %v189_v49 = vmul.f32 1.442695, %v188_v48 }
 0x1fc   :  { %259 = vpow2.f32 %v189_v49 }
 0x206   :  { %v260_v50 = vpop.eup %259 }
 0x207   :  { %v191_v51 = vsel %vm184_vm1, %v260_v50, 0.0 }
 0x208   :  { %192 = vadd.xlane.f32.xlu0 %v191_v51 }
 0x295   :  { %v193_v52 = vpop.xlane.xlu0 %192 }
 0x296   :  { %261 = vrcp.f32 %v193_v52 }
 0x2a0   :  { %v262_v53 = vpop.eup %261 }
 0x2a1   :  { %v195_v54 = vmul.f32 %v262_v53, %v260_v50 }
 0x2a3   :  { %196 = vst.msk [vmem:[%s346_s5] sm:$0xff] %vm184_vm1, %v195_v54 }

</bundles_post_ra>
